<compile_context>
chip_gen: v7x
topology: tpu7x:2x2x1
jax: 0.10.0
libtpu: 0.0.40
codegen_flags: <defaults>
</compile_context>

<pallas_src>
import functools

import jax
import jax.numpy as jnp
from jax.experimental import pallas as pl
from jax.experimental.pallas import tpu as pltpu


def _round_up(x, m):
    return (x + m - 1) // m * m


def _cdiv(a, b):
    return (a + b - 1) // b


# ---------------------------------------------------------------------------
# Kernel
# ---------------------------------------------------------------------------
def _decoder_kernel(z_ref, a_ref, w_ref, o_ref, *,
                    z_in, a_in, ncols, out_dim,
                    off_w0z, off_w0a, off_b0, off_w1, off_b1, off_w2, off_b2,
                    clip_lo, clip_hi):
    """Fused 3-layer MLP on one batch tile; params come from one packed buffer.

    All layers run at padded width `ncols`; padded weight rows/cols are zero so
    the padding is mathematically inert.
    """
    z = z_ref[...]
    a = a_ref[...]

    # Layer 0: split first matmul (replaces torch.cat((z, action), 1) @ W0).
    h = (jnp.dot(z, w_ref[pl.ds(off_w0z, z_in), :],
                 preferred_element_type=jnp.float32)
         + jnp.dot(a, w_ref[pl.ds(off_w0a, a_in), :],
                   preferred_element_type=jnp.float32)
         + w_ref[pl.ds(off_b0, 1), :])
    h = jnp.maximum(h, 0.0)                                    # ReLU

    # Layer 1.
    h = jnp.dot(h, w_ref[pl.ds(off_w1, ncols), :],
                preferred_element_type=jnp.float32) + w_ref[pl.ds(off_b1, 1), :]
    h = jnp.maximum(h, 0.0)                                    # ReLU

    # Layer 2 (no activation on the last layer: apply_last=False).
    out = jnp.dot(h, w_ref[pl.ds(off_w2, ncols), :],
                  preferred_element_type=jnp.float32) + w_ref[pl.ds(off_b2, 1), :]

    if ncols != out_dim:                                       # drop padded lanes
        out = out[:, :out_dim]
    if clip_lo is not None:                                    # torch.clamp(z_clipper)
        out = jnp.clip(out, clip_lo, clip_hi)
    o_ref[...] = out.astype(o_ref.dtype)


# ---------------------------------------------------------------------------
# Parameter packing (call once at setup)
# ---------------------------------------------------------------------------
def pack_params(params, z_in):
    """Pack ((W0,b0),(W1,b1),(W2,b2)) into one contiguous f32 buffer.

    Weights are [in, out] (transpose of torch's nn.Linear.weight), biases [1, out].
    Row layout (every section start is 8-row aligned, columns zero-padded to ncols):
      W0_z | W0_a | b0 | W1 | b1 | W2 | b2
    Returns (packed_buffer, layout_dict_of_static_offsets).
    """
    (w0, b0), (w1, b1), (w2, b2) = params
    a_in = w0.shape[0] - z_in
    ncols = max(w0.shape[1], w1.shape[1], w2.shape[1])
    out_dim = w2.shape[1]

    def pad2(x, rows, cols):
        x = jnp.asarray(x, jnp.float32)
        return jnp.pad(x, ((0, rows - x.shape[0]), (0, cols - x.shape[1])))

    sections = [
        ("w0z", pad2(w0[:z_in], z_in, ncols)),
        ("w0a", pad2(w0[z_in:], a_in, ncols)),
        ("b0", pad2(b0, 1, ncols)),
        ("w1", pad2(w1, ncols, ncols)),
        ("b1", pad2(b1, 1, ncols)),
        ("w2", pad2(w2, ncols, ncols)),
        ("b2", pad2(b2, 1, ncols)),
    ]
    rows, offsets, cur = [], {}, 0
    for name, block in sections:
        offsets[name] = cur
        rows.append(block)
        cur += block.shape[0]
        pad = _round_up(cur, 8) - cur
        if pad:
            rows.append(jnp.zeros((pad, ncols), jnp.float32))
            cur += pad
    packed = jnp.concatenate(rows, axis=0)
    layout = dict(z_in=z_in, a_in=a_in, ncols=ncols, out_dim=out_dim,
                  **{"off_" + k: v for k, v in offsets.items()})
    return packed, layout


# ---------------------------------------------------------------------------
# Batch-tile selection (static, shape-only math)
# ---------------------------------------------------------------------------
def _pick_batch_tile(batch, z_in, a_in, out_dim, ncols, packed_rows,
                     vmem_budget_bytes=16 << 20, max_tile=4096):
    """Largest multiple-of-8 batch tile fitting a conservative VMEM budget,
    re-balanced so the final grid step carries minimal padding."""
    weight_bytes = 4 * packed_rows * ncols
    # Per-row VMEM: double-buffered z/action/out streams + two f32 intermediates.
    per_row = 4 * (2 * (z_in + a_in + out_dim) + 2 * ncols)
    cap = (vmem_budget_bytes - weight_bytes) // max(per_row, 1)
    cap = max(8, min(max_tile, cap) // 8 * 8)
    ntiles = _cdiv(batch, cap)
    return _round_up(_cdiv(batch, ntiles), 8)


# ---------------------------------------------------------------------------
# Wrapper
# ---------------------------------------------------------------------------
def recourse_action_decoder(z, action, packed_w, layout, z_clipper=None,
                            batch_tile=None):
    """Pallas equivalent of RecourseActionDecoder.forward.

    z:        [batch, z_dim*num_nodes]    action: [batch, num_nodes]
    packed_w: result of pack_params() (packed once at setup).
    """
    if z.dtype != jnp.float32:
        z = z.astype(jnp.float32)
    if action.dtype != jnp.float32:
        action = action.astype(jnp.float32)

    batch = z.shape[0]
    z_in, a_in = z.shape[1], action.shape[1]
    ncols, out_dim = layout["ncols"], layout["out_dim"]
    clip_lo, clip_hi = (None, None) if z_clipper is None else z_clipper

    # Batch tiling: tb rows per grid step, weights resident across all steps.
    tb = batch_tile if batch_tile is not None else _pick_batch_tile(
        batch, z_in, a_in, out_dim, ncols, packed_w.shape[0])
    tb = max(8, _round_up(tb, 8))
    b_pad = _round_up(batch, tb)
    if b_pad != batch:
        z = jnp.pad(z, ((0, b_pad - batch), (0, 0)))
        action = jnp.pad(action, ((0, b_pad - batch), (0, 0)))

    kernel = functools.partial(
        _decoder_kernel,
        z_in=z_in, a_in=a_in, ncols=ncols, out_dim=out_dim,
        off_w0z=layout["off_w0z"], off_w0a=layout["off_w0a"],
        off_b0=layout["off_b0"], off_w1=layout["off_w1"],
        off_b1=layout["off_b1"], off_w2=layout["off_w2"],
        off_b2=layout["off_b2"],
        clip_lo=clip_lo, clip_hi=clip_hi)

    out = pl.pallas_call(
        kernel,
        out_shape=jax.ShapeDtypeStruct((b_pad, out_dim), jnp.float32),
        grid_spec=pltpu.PrefetchScalarGridSpec(
            num_scalar_prefetch=0,
            grid=(b_pad // tb,),
            in_specs=[
                pl.BlockSpec((tb, z_in), lambda i: (i, 0)),
                pl.BlockSpec((tb, a_in), lambda i: (i, 0)),
                # One packed param buffer, same block every step -> VMEM-resident.
                pl.BlockSpec(packed_w.shape, lambda i: (0, 0)),
            ],
            out_specs=pl.BlockSpec((tb, out_dim), lambda i: (i, 0)),
        ),
        compiler_params=pltpu.CompilerParams(
            dimension_semantics=("parallel",)),   # shards batch over v7x's 2 TCs
    )(z, action, packed_w)

    return out if b_pad == batch else out[:batch]


# ---------------------------------------------------------------------------
# Init + reference (for the correctness check)
# ---------------------------------------------------------------------------
def init_params(key, dims, gain):
    """xavier_uniform(gain) weights [in,out], bias filled with 0.01 (matches _init_weights)."""
    params = []
    for fan_in, fan_out in zip(dims[:-1], dims[1:]):
        key, wk = jax.random.split(key)
        bound = gain * jnp.sqrt(6.0 / (fan_in + fan_out))
        w = jax.random.uniform(wk, (fan_in, fan_out), jnp.float32, -bound, bound)
        b = jnp.full((1, fan_out), 0.01, jnp.float32)
        params.append((w, b))
    return params


def _reference(z, action, params, z_clipper):
    x = jnp.concatenate([z, action], axis=1)
    (w0, b0), (w1, b1), (w2, b2) = params
    h = jnp.maximum(x @ w0 + b0, 0.0)
    h = jnp.maximum(h @ w1 + b1, 0.0)
    out = h @ w2 + b2
    if z_clipper is not None:
        out = jnp.clip(out, z_clipper[0], z_clipper[1])
    return out


if __name__ == "__main__":
    # Small shapes consistent with the module.
    z_dim, num_nodes, batch = 4, 4, 8
    h_dim_list = [32, 32]
    in_dim = z_dim * num_nodes + num_nodes      # 20
    out_dim = num_nodes * z_dim                 # 16
    dims = [in_dim] + h_dim_list + [out_dim]    # [20, 32, 32, 16]
    z_clipper = (-1.0, 1.0)
    relu_gain = float(jnp.sqrt(2.0))            # nn.init.calculate_gain('relu')

    key = jax.random.PRNGKey(0)
    kz, ka, kp = jax.random.split(key, 3)
    z = jax.random.normal(kz, (batch, z_dim * num_nodes), jnp.float32)
    action = jax.random.normal(ka, (batch, num_nodes), jnp.float32)
    params = init_params(kp, dims, relu_gain)

    # Pack parameters once (setup time), then run the fused kernel (jitted so
    # the pad/slice plumbing fuses with the pallas_call).
    packed_w, layout = pack_params(params, z_in=z_dim * num_nodes)
    fwd = jax.jit(lambda zz, aa, ww: recourse_action_decoder(
        zz, aa, ww, layout, z_clipper=z_clipper))
    out = jax.block_until_ready(fwd(z, action, packed_w))

    ref = _reference(z, action, params, z_clipper)
    assert out.shape == (batch, out_dim)
    assert jnp.allclose(out, ref, atol=1e-5, rtol=1e-5), "mismatch vs reference"

    print("KERNEL_OK")
</pallas_src>

<mosaic_0001>
module attributes {stable_mosaic.version = 11 : i64} {
  func.func @_decoder_kernel(%arg0: i32, %arg1: memref<8x16xf32, #tpu.memory_space<vmem>>, %arg2: memref<8x4xf32, #tpu.memory_space<vmem>>, %arg3: memref<112x32xf32, #tpu.memory_space<vmem>>, %arg4: memref<8x16xf32, #tpu.memory_space<vmem>>) attributes {dimension_semantics = [#tpu.dimension_semantics<parallel>], iteration_bounds = array<i64: 1>, scalar_prefetch = 0 : i64, scratch_operands = 0 : i64, tpu.core_type = #tpu.core_type<tc>, window_params = [{transform_indices = @transform_0, window_bounds = array<i64: 8, 16>}, {transform_indices = @transform_1, window_bounds = array<i64: 8, 4>}, {pipeline_mode = #tpu.pipeline_mode<synchronous>, transform_indices = @transform_2, window_bounds = array<i64: 112, 32>}, {transform_indices = @transform_3, window_bounds = array<i64: 8, 16>}]} {
    %c0 = arith.constant 0 : index
    %c0_0 = arith.constant 0 : index
    %0 = vector.load %arg1[%c0, %c0_0] : memref<8x16xf32, #tpu.memory_space<vmem>>, vector<8x16xf32>
    %c0_1 = arith.constant 0 : index
    %c0_2 = arith.constant 0 : index
    %1 = vector.load %arg2[%c0_1, %c0_2] : memref<8x4xf32, #tpu.memory_space<vmem>>, vector<8x4xf32>
    %c0_3 = arith.constant 0 : index
    %c0_4 = arith.constant 0 : index
    %2 = vector.load %arg3[%c0_3, %c0_4] : memref<112x32xf32, #tpu.memory_space<vmem>>, vector<16x32xf32>
    %cst = arith.constant dense<0.000000e+00> : vector<8x32xf32>
    %3 = tpu.matmul %0, %2, %cst {dimension_numbers = #tpu.dot_dimension_numbers<[1], [0], [0], [1], [0, 0, 1, 1], [], []>} : vector<8x16xf32>, vector<16x32xf32>, vector<8x32xf32> -> vector<8x32xf32>
    %c16 = arith.constant 16 : index
    %c0_5 = arith.constant 0 : index
    %4 = vector.load %arg3[%c16, %c0_5] : memref<112x32xf32, #tpu.memory_space<vmem>>, vector<4x32xf32>
    %cst_6 = arith.constant dense<0.000000e+00> : vector<8x32xf32>
    %5 = tpu.matmul %1, %4, %cst_6 {dimension_numbers = #tpu.dot_dimension_numbers<[1], [0], [0], [1], [0, 0, 1, 1], [], []>} : vector<8x4xf32>, vector<4x32xf32>, vector<8x32xf32> -> vector<8x32xf32>
    %6 = arith.addf %3, %5 : vector<8x32xf32>
    %c24 = arith.constant 24 : index
    %c0_7 = arith.constant 0 : index
    %7 = vector.load %arg3[%c24, %c0_7] : memref<112x32xf32, #tpu.memory_space<vmem>>, vector<1x32xf32>
    %8 = vector.broadcast %7 : vector<1x32xf32> to vector<8x32xf32>
    %9 = arith.addf %6, %8 : vector<8x32xf32>
    %cst_8 = arith.constant 0.000000e+00 : f32
    %10 = vector.broadcast %cst_8 : f32 to vector<8x32xf32>
    %11 = arith.maximumf %9, %10 : vector<8x32xf32>
    %c32 = arith.constant 32 : index
    %c0_9 = arith.constant 0 : index
    %12 = vector.load %arg3[%c32, %c0_9] : memref<112x32xf32, #tpu.memory_space<vmem>>, vector<32x32xf32>
    %cst_10 = arith.constant dense<0.000000e+00> : vector<8x32xf32>
    %13 = tpu.matmul %11, %12, %cst_10 {dimension_numbers = #tpu.dot_dimension_numbers<[1], [0], [0], [1], [0, 0, 1, 1], [], []>} : vector<8x32xf32>, vector<32x32xf32>, vector<8x32xf32> -> vector<8x32xf32>
    %c64 = arith.constant 64 : index
    %c0_11 = arith.constant 0 : index
    %14 = vector.load %arg3[%c64, %c0_11] : memref<112x32xf32, #tpu.memory_space<vmem>>, vector<1x32xf32>
    %15 = vector.broadcast %14 : vector<1x32xf32> to vector<8x32xf32>
    %16 = arith.addf %13, %15 : vector<8x32xf32>
    %cst_12 = arith.constant 0.000000e+00 : f32
    %17 = vector.broadcast %cst_12 : f32 to vector<8x32xf32>
    %18 = arith.maximumf %16, %17 : vector<8x32xf32>
    %c72 = arith.constant 72 : index
    %c0_13 = arith.constant 0 : index
    %19 = vector.load %arg3[%c72, %c0_13] : memref<112x32xf32, #tpu.memory_space<vmem>>, vector<32x32xf32>
    %cst_14 = arith.constant dense<0.000000e+00> : vector<8x32xf32>
    %20 = tpu.matmul %18, %19, %cst_14 {dimension_numbers = #tpu.dot_dimension_numbers<[1], [0], [0], [1], [0, 0, 1, 1], [], []>} : vector<8x32xf32>, vector<32x32xf32>, vector<8x32xf32> -> vector<8x32xf32>
    %c104 = arith.constant 104 : index
    %c0_15 = arith.constant 0 : index
    %21 = vector.load %arg3[%c104, %c0_15] : memref<112x32xf32, #tpu.memory_space<vmem>>, vector<1x32xf32>
    %22 = vector.broadcast %21 : vector<1x32xf32> to vector<8x32xf32>
    %23 = arith.addf %20, %22 : vector<8x32xf32>
    %24 = vector.extract_strided_slice %23 {offsets = [0, 0], sizes = [8, 16], strides = [1, 1]} : vector<8x32xf32> to vector<8x16xf32>
    %cst_16 = arith.constant -1.000000e+00 : f32
    %cst_17 = arith.constant 1.000000e+00 : f32
    %25 = vector.broadcast %cst_16 : f32 to vector<8x16xf32>
    %26 = arith.maximumf %25, %24 : vector<8x16xf32>
    %27 = vector.broadcast %cst_17 : f32 to vector<8x16xf32>
    %28 = arith.minimumf %27, %26 : vector<8x16xf32>
    %c0_18 = arith.constant 0 : index
    %c0_19 = arith.constant 0 : index
    %29 = vector.load %arg4[%c0_18, %c0_19] : memref<8x16xf32, #tpu.memory_space<vmem>>, vector<8x16xf32>
    tpu.vector_store %arg4[%c0_18, %c0_19], %28 {strides = array<i32>} : memref<8x16xf32, #tpu.memory_space<vmem>>, vector<8x16xf32>,
    return
  }
  func.func @transform_0(%arg0: i32) -> (i32, i32) {
    %c0_i32 = arith.constant 0 : i32
    %c0_i32_0 = arith.constant 0 : i32
    return %arg0, %c0_i32 : i32, i32
  }
  func.func @transform_1(%arg0: i32) -> (i32, i32) {
    %c0_i32 = arith.constant 0 : i32
    %c0_i32_0 = arith.constant 0 : i32
    return %arg0, %c0_i32 : i32, i32
  }
  func.func @transform_2(%arg0: i32) -> (i32, i32) {
    %c0_i32 = arith.constant 0 : i32
    %c0_i32_0 = arith.constant 0 : i32
    %c0_i32_1 = arith.constant 0 : i32
    return %c0_i32, %c0_i32_0 : i32, i32
  }
  func.func @transform_3(%arg0: i32) -> (i32, i32) {
    %c0_i32 = arith.constant 0 : i32
    %c0_i32_0 = arith.constant 0 : i32
    return %arg0, %c0_i32 : i32, i32
  }
}

</mosaic_0001>

<bundles_post_ra>
// kernel: _lambda_.1
= control target key start
LH: loop header
LB: loop body
LE: loop exit
PB: predicated region body
PF: predicated region fallthrough
CT: control target
= control target key end

     0   :  { %v463_v3 = vmov 0.0|0.0   ;;  %v464_v4 = vmov 0.0   ;;  %vm24_vm0 = vcmask 1043456   ;;  %vm20_vm1 = vcmask 31744   ;;  %s549_s0 = inlined_call_operand.vmem [shape: f32[8,16], index: 0, kind: input, shape index: {}]   ;;  %s550_s1 = inlined_call_operand.vmem [shape: f32[8,4], index: 1, kind: input, shape index: {}]   ;;  %s551_s2 = inlined_call_operand.vmem [shape: f32[112,32], index: 2, kind: input, shape index: {}]   ;;  %s552_s3 = inlined_call_operand.hbm [shape: f32[8,16], index: 3, kind: output, shape index: {}]  }
   0x1   :  { %v17_v0 = vld [vmem:[%s551_s2] sm:$0xff]  ;;  %v18_v1 = vld [vmem:[%s551_s2 + $0x8] sm:$0xff]  ;;  %v19_v2 = vld [vmem:[%s551_s2 + $0x10] sm:$0xf]  ;;  %420 = vmatprep.subr.bf16.mxu1 %v463_v3  ;;  %386 = vmatprep.subr.mxu0 %v464_v4  ;;  %vm465_vm2 = vmmov 0  }
   0x2   :  { %v421_v5 = vpack.c.bf16 %v18_v1, %v17_v0  ;;  %v16_v6 = vld [vmem:[%s550_s1] sm:$0xff]  ;;  %387 = vmatpush3.msk.msra.mxu0 %vm24_vm0, %v19_v2  ;;  %388 = vmatprep.mubr.msk.f32.mxu0 %vm465_vm2, %v464_v4 }
   0x3   :  { %8 = vsyncpa [#allocation3], 0  ;;  %389 = vmatmul.mubr.msk.f32.vlgmr.msra.gmra.mrb[0].mxu0 %vm20_vm1, %v16_v6  ;;  %v15_v7 = vld [vmem:[%s549_s0] sm:$0xff]  ;;  %vm98_vm3 = vcmask 130048   ;;  %395 = vmatprep.mubr.msk.f32.mxu1 %vm465_vm2, %v464_v4  ;;  %v180_v9 = vld [vmem:[%s551_s2 + $0x28] sm:$0xff]  ;;  %vm188_vm4 = vcmask 261120  }
   0x4   :  { %422 = vmatpush3.bf16.msra.mxu1 %v421_v5  ;;  %423 = vmatprep.subr.bf16.mxu0 %v463_v3  ;;  %v179_v8 = vld [vmem:[%s551_s2 + $0x20] sm:$0xff]  ;;  %v181_v11 = vld [vmem:[%s551_s2 + $0x30] sm:$0xff]  ;;  %v182_v12 = vld [vmem:[%s551_s2 + $0x38] sm:$0xff]  ;;  %s466_s15 = smov [#allocation2]  }
   0x5   :  { %406 = vmatprep.mubr.msk.f32.mxu0 %vm465_vm2, %v464_v4  ;;  %429 = vmatprep.subr.bf16.mxu1 %v463_v3  ;;  %v424_v10 = vpack.c.bf16 %v180_v9, %v179_v8  ;;  %v427_v13 = vpack.c.bf16 %v182_v12, %v181_v11  ;;  %v263_v14 = vld [vmem:[%s551_s2 + $0x48] sm:$0xff]  ;;  %v264_v15 = vld [vmem:[%s551_s2 + $0x50] sm:$0xff]  ;;  %v365_v20 = vld [vmem:[%s551_s2 + $0x18] ss:$0 sm:$0xff]  ;;  %s354_s16 = sshll.u32 %s466_s15, 4  ;;  %s355_s16 = int_to_ptr.vmem [resolvable:$true] %s354_s16 }
   0x6   :  { %v430_v16 = vpack.c.bf16 %v264_v15, %v263_v14  ;;  %v265_v25 = vld [vmem:[%s551_s2 + $0x58] sm:$0xff]  ;;  %v266_v26 = vld [vmem:[%s551_s2 + $0x60] sm:$0xff]  ;;  %v368_v33 = vld [vmem:[%s551_s2 + $0x68] ss:$0 sm:$0xff]  ;;  %s439_s17 = scalar_lea.vmem %s355_s16, 128  ;;  %p444_p1 = scmp.lt.s32.totalorder %s355_s16, %s355_s16 }
   0x7   :  { %396 = vmatmul.mubr.msk.f32.vlgmr.msra.gmra.mrb[0].mxu1 %vm98_vm3, %v15_v7  ;;  %425 = vmatpush3.bf16.msra.mxu0 %v424_v10  ;;  %v433_v27 = vpack.c.bf16 %v266_v26, %v265_v25  ;;  %v366_v28 = vld [vmem:[%s551_s2 + $0x40] ss:$0 sm:$0xff]  ;;  %p440_p0 = scmp.ne.s32.totalorder %s355_s16, %s439_s17  ;;  %p445_p2 = scmp.lt.s32.totalorder %s439_s17, %s439_s17 }
   0x8   :  { %417 = vmatprep.mubr.msk.f32.mxu1 %vm465_vm2, %v464_v4  ;;  %426 = vmatprep.subr.bf16.mxu0 %v463_v3 }
   0x9   :  { %431 = vmatpush3.bf16.msra.mxu1 %v430_v16  ;;  %p446_p3 = por %p445_p2, %p444_p1 }
   0xa   :  { %432 = vmatprep.subr.bf16.mxu1 %v463_v3 }
   0xb   :  { %428 = vmatpush3.bf16.msra.mxu0 %v427_v13  ;;  %p447_p4 = pnand %p446_p3, %p440_p0 }
   0xd   :  { %434 = vmatpush3.bf16.msra.mxu1 %v433_v27 }
  0xd6   :  { %v94_v17 = vpop.f32.mrb[0].mxu0 }
  0xd7   :  { %v390_v18 = vpop.f32.mrb[1].mxu0 }
  0xda   :  { %v168_v19 = vpop.f32.mrb[0].mxu1 }
  0xdb   :  { %v169_v21 = vadd.f32 %v168_v19, %v94_v17  ;;  %v397_v22 = vpop.f32.mrb[1].mxu1 }
  0xdd   :  { %v177_v23 = vadd.f32 %v365_v20, %v169_v21 }
  0xdf   :  { %v178_v24 = vmax.f32 %v177_v23, 0.0 }
  0xe1   :  { %407 = vmatmul.mubr.msk.f32.vlgmr.msra.gmra.mrb[2].mxu0 %vm188_vm4, %v178_v24 }
 0x1b4   :  { %v258_v29 = vpop.f32.mrb[2].mxu0 }
 0x1b5   :  { %v259_v30 = vadd.f32 %v366_v28, %v258_v29  ;;  %v408_v31 = vpop.f32.mrb[3].mxu0 }
 0x1b7   :  { %v262_v32 = vmax.f32 %v259_v30, 0.0 }
 0x1b9   :  { %418 = vmatmul.mubr.msk.f32.vlgmr.msra.gmra.mrb[2].mxu1 %vm188_vm4, %v262_v32 }
 0x28c   :  { %v341_v34 = vpop.f32.mrb[2].mxu1 }
 0x28d   :  { %v342_v35 = vadd.f32 %v368_v33, %v341_v34  ;;  %v419_v36 = vpop.f32.mrb[3].mxu1 }
 0x28f   :  { %v370_v37 = vclamps-f32 %v342_v35, 1.0 }
 0x291   :  { %347 = vst.msk [vmem:[#allocation2] sm:$0xff] %vm98_vm3, %v370_v37 }
 0x292   :  { %450 = shalt.err (!%p447_p4)
}
 0x293   :  { %s451_s2 = scalar_lea.hbm %s552_s3, 128 }
 0x294   :  { %p452_p5 = scmp.ne.s32.totalorder %s552_s3, %s451_s2  ;;  %p455_p6 = scmp.lt.u32.totalorder %s451_s2, %s552_s3 }
 0x296   :  { %p457_p7 = pnand %p455_p6, %p452_p5 }
 0x298   :  { %460 = shalt.err (!%p457_p7)
}
 0x299   :  { %357 = dma.vmem_to_hbm [thread:$0]  %s355_s16, 128, %s552_s3, [#allocation3]  }
 0x29a   :  { %461 = dma.done.wait [#allocation3], 128  }
 0x29b   :  { %462 = vsyncadd [#allocation3], 4294967168 }
 0x29c   :  { %361 = vsyncpa [#allocation3], 1 }

</bundles_post_ra>
